<compile_context>
chip_gen: v5e
topology: v5e:2x2
jax: 0.10.0
libtpu: 0.0.40
codegen_flags: <defaults>
</compile_context>

<pallas_src>
import jax
import jax.numpy as jnp
from jax.experimental import pallas as pl
from jax.experimental.pallas import tpu as pltpu

EPS = 1e-5
LANE = 128


def _round_up(n, m):
    return ((n + m - 1) // m) * m


def _pad_axis(a, axis, target, value=0.0):
    pad = target - a.shape[axis]
    if pad == 0:
        return a
    widths = [(0, 0)] * a.ndim
    widths[axis] = (0, pad)
    return jnp.pad(a, widths, constant_values=value)


def _batchnorm_train(h, gamma, beta):
    # training-mode BatchNorm1d: per-feature batch mean, biased batch variance
    mean = jnp.mean(h, axis=0, keepdims=True)
    centered = h - mean
    var = jnp.mean(centered * centered, axis=0, keepdims=True)
    return centered * jax.lax.rsqrt(var + EPS) * gamma + beta


def _mlp_resnet_kernel(x_ref, w_first_ref, b_first_ref,
                       bn1_g_ref, bn1_b_ref, w1_ref, b1_ref,
                       bn2_g_ref, bn2_b_ref, w2_ref, b2_ref,
                       w_last_ref, b_last_ref,
                       o_ref, h_ref):
    blk = pl.program_id(0)

    # first affine: in_channels -> residual_channels (only on the first grid step)
    @pl.when(blk == 0)
    def _first_affine():
        h_ref[...] = (jnp.dot(x_ref[...], w_first_ref[...],
                              preferred_element_type=jnp.float32)
                      + b_first_ref[...])

    # one residual block per grid step; h_ref persists across steps
    h = h_ref[...]
    y = _batchnorm_train(h, bn1_g_ref[0], bn1_b_ref[0])
    y = jnp.maximum(y, 0.0).astype(jnp.bfloat16)
    y = jnp.dot(y, w1_ref[0], preferred_element_type=jnp.float32) + b1_ref[0]
    y = _batchnorm_train(y, bn2_g_ref[0], bn2_b_ref[0])
    y = jnp.maximum(y, 0.0).astype(jnp.bfloat16)
    y = jnp.dot(y, w2_ref[0], preferred_element_type=jnp.float32) + b2_ref[0]
    h_ref[...] = h + y

    # last affine: residual_channels -> out_channels (only on the last grid step)
    @pl.when(blk == pl.num_programs(0) - 1)
    def _last_affine():
        o_ref[...] = (jnp.dot(h_ref[...].astype(jnp.bfloat16), w_last_ref[...],
                              preferred_element_type=jnp.float32)
                      + b_last_ref[...]).astype(o_ref.dtype)


def mlp_resnet_forward(signatures, params, num_blocks):
    """signatures: nested list-of-lists of (B, c_i) arrays. params: dict of logical weights."""
    assert num_blocks >= 1
    flattened = [s for group in signatures for s in group]
    x = jnp.concatenate(flattened, axis=1).astype(jnp.float32)

    B, in_c = x.shape
    R = params["w_first"].shape[1]
    Bc = params["w1"].shape[2]
    out_c = params["w_last"].shape[1]

    in_p = _round_up(in_c, LANE)
    R_p = _round_up(R, LANE)
    Bc_p = _round_up(Bc, LANE)
    out_p = _round_up(out_c, LANE)

    # pad to lane-friendly widths; cast weights to bf16, keep BN/bias/accumulator in f32
    x_p = _pad_axis(x, 1, in_p).astype(jnp.bfloat16)
    w_first = _pad_axis(_pad_axis(params["w_first"], 0, in_p), 1, R_p).astype(jnp.bfloat16)
    b_first = _pad_axis(params["b_first"], 1, R_p)
    bn1_g = _pad_axis(params["bn1_g"], 2, R_p, 1.0)
    bn1_b = _pad_axis(params["bn1_b"], 2, R_p)
    w1 = _pad_axis(_pad_axis(params["w1"], 1, R_p), 2, Bc_p).astype(jnp.bfloat16)
    b1 = _pad_axis(params["b1"], 2, Bc_p)
    bn2_g = _pad_axis(params["bn2_g"], 2, Bc_p, 1.0)
    bn2_b = _pad_axis(params["bn2_b"], 2, Bc_p)
    w2 = _pad_axis(_pad_axis(params["w2"], 1, Bc_p), 2, R_p).astype(jnp.bfloat16)
    b2 = _pad_axis(params["b2"], 2, R_p)
    w_last = _pad_axis(_pad_axis(params["w_last"], 0, R_p), 1, out_p).astype(jnp.bfloat16)
    b_last = _pad_axis(params["b_last"], 1, out_p)

    args = (x_p, w_first, b_first, bn1_g, bn1_b, w1, b1, bn2_g, bn2_b, w2, b2,
            w_last, b_last)

    grid_spec = pltpu.PrefetchScalarGridSpec(
        num_scalar_prefetch=0,
        grid=(num_blocks,),
        in_specs=[
            pl.BlockSpec((B, in_p), lambda blk: (0, 0)),            # x
            pl.BlockSpec((in_p, R_p), lambda blk: (0, 0)),          # w_first
            pl.BlockSpec((1, R_p), lambda blk: (0, 0)),             # b_first
            pl.BlockSpec((1, 1, R_p), lambda blk: (blk, 0, 0)),     # bn1 gamma
            pl.BlockSpec((1, 1, R_p), lambda blk: (blk, 0, 0)),     # bn1 beta
            pl.BlockSpec((1, R_p, Bc_p), lambda blk: (blk, 0, 0)),  # w1
            pl.BlockSpec((1, 1, Bc_p), lambda blk: (blk, 0, 0)),    # b1
            pl.BlockSpec((1, 1, Bc_p), lambda blk: (blk, 0, 0)),    # bn2 gamma
            pl.BlockSpec((1, 1, Bc_p), lambda blk: (blk, 0, 0)),    # bn2 beta
            pl.BlockSpec((1, Bc_p, R_p), lambda blk: (blk, 0, 0)),  # w2
            pl.BlockSpec((1, 1, R_p), lambda blk: (blk, 0, 0)),     # b2
            pl.BlockSpec((R_p, out_p), lambda blk: (0, 0)),         # w_last
            pl.BlockSpec((1, out_p), lambda blk: (0, 0)),           # b_last
        ],
        out_specs=pl.BlockSpec((B, out_p), lambda blk: (0, 0)),
        scratch_shapes=[pltpu.VMEM((B, R_p), jnp.float32)],         # residual stream h
    )

    # VMEM budget: fixed tensors + 2x (double buffer) one block's weights + activation temps
    fixed_bytes = (x_p.size * 2 + w_first.size * 2 + w_last.size * 2
                   + (b_first.size + b_last.size) * 4
                   + B * out_p * 4            # output block
                   + B * R_p * 4)             # h scratch
    per_block_bytes = (2 * R_p * Bc_p * 2                     # w1 + w2 (bf16)
                       + (3 * R_p + 3 * Bc_p) * 4)            # bn gamma/beta + biases
    act_bytes = 4 * B * (R_p + Bc_p) * 4                      # activation temporaries
    vmem_bytes = int(1.5 * (fixed_bytes + 2 * per_block_bytes + act_bytes)) + (2 << 20)
    vmem_bytes = min(max(vmem_bytes, 8 * 1024 * 1024), 48 * 1024 * 1024)

    flops = 2 * B * (in_p * R_p + num_blocks * 2 * R_p * Bc_p + R_p * out_p)
    bytes_accessed = sum(int(a.size) * a.dtype.itemsize for a in args) + B * out_p * 4
    cost = pl.CostEstimate(flops=flops,
                           transcendentals=num_blocks * (R_p + Bc_p),
                           bytes_accessed=bytes_accessed)

    out_padded = pl.pallas_call(
        _mlp_resnet_kernel,
        out_shape=jax.ShapeDtypeStruct((B, out_p), jnp.float32),
        grid_spec=grid_spec,
        compiler_params=pltpu.CompilerParams(
            dimension_semantics=("arbitrary",),
            vmem_limit_bytes=vmem_bytes),
        cost_estimate=cost,
    )(*args)

    return out_padded[:, :out_c]


def init_params(key, in_channels, out_channels, residual_channels, block_channels,
                num_blocks):
    ks = jax.random.split(key, 13)
    p = {}
    p["w_first"] = jax.random.normal(ks[0], (in_channels, residual_channels),
                                     jnp.float32) * 0.1
    p["b_first"] = jax.random.normal(ks[1], (1, residual_channels), jnp.float32) * 0.1
    p["bn1_g"] = 1.0 + 0.1 * jax.random.normal(ks[2], (num_blocks, 1, residual_channels),
                                               jnp.float32)
    p["bn1_b"] = 0.1 * jax.random.normal(ks[3], (num_blocks, 1, residual_channels),
                                         jnp.float32)
    p["w1"] = jax.random.normal(ks[4], (num_blocks, residual_channels, block_channels),
                                jnp.float32) * 0.1
    p["b1"] = 0.1 * jax.random.normal(ks[5], (num_blocks, 1, block_channels), jnp.float32)
    p["bn2_g"] = 1.0 + 0.1 * jax.random.normal(ks[6], (num_blocks, 1, block_channels),
                                               jnp.float32)
    p["bn2_b"] = 0.1 * jax.random.normal(ks[7], (num_blocks, 1, block_channels),
                                         jnp.float32)
    p["w2"] = jax.random.normal(ks[8], (num_blocks, block_channels, residual_channels),
                                jnp.float32) * 0.1
    p["b2"] = 0.1 * jax.random.normal(ks[9], (num_blocks, 1, residual_channels),
                                      jnp.float32)
    p["w_last"] = jax.random.normal(ks[10], (residual_channels, out_channels),
                                    jnp.float32) * 0.1
    p["b_last"] = 0.1 * jax.random.normal(ks[11], (1, out_channels), jnp.float32)
    return p


def reference_forward(signatures, params, num_blocks):
    """Pure-JAX reference mirroring the kernel's mixed-precision policy (bf16 MXU inputs,
    f32 accumulation, f32 BatchNorm)."""
    flattened = [s for group in signatures for s in group]
    x = jnp.concatenate(flattened, axis=1).astype(jnp.float32)

    def bdot(a, w):
        return jnp.dot(a.astype(jnp.bfloat16), w.astype(jnp.bfloat16),
                       preferred_element_type=jnp.float32)

    h = bdot(x, params["w_first"]) + params["b_first"]
    for blk in range(num_blocks):
        y = _batchnorm_train(h, params["bn1_g"][blk], params["bn1_b"][blk])
        y = jnp.maximum(y, 0.0)
        y = bdot(y, params["w1"][blk]) + params["b1"][blk]
        y = _batchnorm_train(y, params["bn2_g"][blk], params["bn2_b"][blk])
        y = jnp.maximum(y, 0.0)
        y = bdot(y, params["w2"][blk]) + params["b2"][blk]
        h = h + y
    return bdot(h, params["w_last"]) + params["b_last"]


if __name__ == "__main__":
    # small shapes: batch=8, in_channels=16 (split across 3 signature tensors),
    # residual_channels=32, block_channels=64, out_channels=4, num_blocks=2
    batch = 8
    in_channels = 16
    out_channels = 4
    residual_channels = 32
    block_channels = 64
    num_blocks = 2

    key = jax.random.PRNGKey(0)
    k_sig, k_par = jax.random.split(key)

    ks = jax.random.split(k_sig, 3)
    signatures = [
        [jax.random.normal(ks[0], (batch, 6), jnp.float32),
         jax.random.normal(ks[1], (batch, 4), jnp.float32)],
        [jax.random.normal(ks[2], (batch, 6), jnp.float32)],
    ]

    params = init_params(k_par, in_channels, out_channels, residual_channels,
                         block_channels, num_blocks)

    out = mlp_resnet_forward(signatures, params, num_blocks)
    out = jax.block_until_ready(out)

    ref = reference_forward(signatures, params, num_blocks)
    assert out.shape == (batch, out_channels)
    assert jnp.allclose(out, ref, atol=1e-3, rtol=1e-3), "mismatch vs JAX reference"

    print("KERNEL_OK")
</pallas_src>

<mosaic_0001>
module attributes {stable_mosaic.version = 11 : i64} {
  func.func @_mlp_resnet_kernel(%arg0: i32, %arg1: memref<8x128xbf16, #tpu.memory_space<vmem>>, %arg2: memref<128x128xbf16, #tpu.memory_space<vmem>>, %arg3: memref<1x128xf32, #tpu.memory_space<vmem>>, %arg4: memref<1x1x128xf32, #tpu.memory_space<vmem>>, %arg5: memref<1x1x128xf32, #tpu.memory_space<vmem>>, %arg6: memref<1x128x128xbf16, #tpu.memory_space<vmem>>, %arg7: memref<1x1x128xf32, #tpu.memory_space<vmem>>, %arg8: memref<1x1x128xf32, #tpu.memory_space<vmem>>, %arg9: memref<1x1x128xf32, #tpu.memory_space<vmem>>, %arg10: memref<1x128x128xbf16, #tpu.memory_space<vmem>>, %arg11: memref<1x1x128xf32, #tpu.memory_space<vmem>>, %arg12: memref<128x128xbf16, #tpu.memory_space<vmem>>, %arg13: memref<1x128xf32, #tpu.memory_space<vmem>>, %arg14: memref<8x128xf32, #tpu.memory_space<vmem>>, %arg15: memref<8x128xf32, #tpu.memory_space<vmem>>) attributes {dimension_semantics = [#tpu.dimension_semantics<arbitrary>], iteration_bounds = array<i64: 2>, scalar_prefetch = 0 : i64, scratch_operands = 1 : i64, tpu.core_type = #tpu.core_type<tc>, window_params = [{pipeline_mode = #tpu.pipeline_mode<synchronous>, transform_indices = @transform_0, window_bounds = array<i64: 8, 128>}, {pipeline_mode = #tpu.pipeline_mode<synchronous>, transform_indices = @transform_1, window_bounds = array<i64: 128, 128>}, {pipeline_mode = #tpu.pipeline_mode<synchronous>, transform_indices = @transform_2, window_bounds = array<i64: 1, 128>}, {transform_indices = @transform_3, window_bounds = array<i64: 1, 1, 128>}, {transform_indices = @transform_4, window_bounds = array<i64: 1, 1, 128>}, {transform_indices = @transform_5, window_bounds = array<i64: 1, 128, 128>}, {transform_indices = @transform_6, window_bounds = array<i64: 1, 1, 128>}, {transform_indices = @transform_7, window_bounds = array<i64: 1, 1, 128>}, {transform_indices = @transform_8, window_bounds = array<i64: 1, 1, 128>}, {transform_indices = @transform_9, window_bounds = array<i64: 1, 128, 128>}, {transform_indices = @transform_10, window_bounds = array<i64: 1, 1, 128>}, {pipeline_mode = #tpu.pipeline_mode<synchronous>, transform_indices = @transform_11, window_bounds = array<i64: 128, 128>}, {pipeline_mode = #tpu.pipeline_mode<synchronous>, transform_indices = @transform_12, window_bounds = array<i64: 1, 128>}, {pipeline_mode = #tpu.pipeline_mode<synchronous>, transform_indices = @transform_13, window_bounds = array<i64: 8, 128>}]} {
    %c0_i32 = arith.constant 0 : i32
    %0 = arith.cmpi eq, %arg0, %c0_i32 : i32
    %1 = arith.extui %0 : i1 to i32
    %c0_i32_0 = arith.constant 0 : i32
    %2 = arith.cmpi ne, %1, %c0_i32_0 : i32
    scf.if %2 {
      %c0_42 = arith.constant 0 : index
      %c0_43 = arith.constant 0 : index
      %77 = vector.load %arg1[%c0_42, %c0_43] : memref<8x128xbf16, #tpu.memory_space<vmem>>, vector<8x128xbf16>
      %c0_44 = arith.constant 0 : index
      %c0_45 = arith.constant 0 : index
      %78 = vector.load %arg2[%c0_44, %c0_45] : memref<128x128xbf16, #tpu.memory_space<vmem>>, vector<128x128xbf16>
      %cst_46 = arith.constant dense<0.000000e+00> : vector<8x128xf32>
      %79 = tpu.matmul %77, %78, %cst_46 {dimension_numbers = #tpu.dot_dimension_numbers<[1], [0], [0], [1], [0, 0, 1, 1], [], []>} : vector<8x128xbf16>, vector<128x128xbf16>, vector<8x128xf32> -> vector<8x128xf32>
      %c0_47 = arith.constant 0 : index
      %c0_48 = arith.constant 0 : index
      %80 = vector.load %arg3[%c0_47, %c0_48] : memref<1x128xf32, #tpu.memory_space<vmem>>, vector<1x128xf32>
      %81 = vector.broadcast %80 : vector<1x128xf32> to vector<8x128xf32>
      %82 = arith.addf %79, %81 : vector<8x128xf32>
      %c0_49 = arith.constant 0 : index
      %c0_50 = arith.constant 0 : index
      %83 = vector.load %arg15[%c0_49, %c0_50] : memref<8x128xf32, #tpu.memory_space<vmem>>, vector<8x128xf32>
      tpu.vector_store %arg15[%c0_49, %c0_50], %82 {strides = array<i32>} : memref<8x128xf32, #tpu.memory_space<vmem>>, vector<8x128xf32>,
    } else {
    }
    %c0 = arith.constant 0 : index
    %c0_1 = arith.constant 0 : index
    %3 = vector.load %arg15[%c0, %c0_1] : memref<8x128xf32, #tpu.memory_space<vmem>>, vector<8x128xf32>
    %c0_2 = arith.constant 0 : index
    %c0_3 = arith.constant 0 : index
    %c0_4 = arith.constant 0 : index
    %4 = vector.load %arg4[%c0_2, %c0_3, %c0_4] : memref<1x1x128xf32, #tpu.memory_space<vmem>>, vector<1x1x128xf32>
    %5 = vector.shape_cast %4 : vector<1x1x128xf32> to vector<1x128xf32>
    %c0_5 = arith.constant 0 : index
    %c0_6 = arith.constant 0 : index
    %c0_7 = arith.constant 0 : index
    %6 = vector.load %arg5[%c0_5, %c0_6, %c0_7] : memref<1x1x128xf32, #tpu.memory_space<vmem>>, vector<1x1x128xf32>
    %7 = vector.shape_cast %6 : vector<1x1x128xf32> to vector<1x128xf32>
    %cst = arith.constant dense<0.000000e+00> : vector<128xf32>
    %8 = vector.multi_reduction <add>, %3, %cst [0] : vector<8x128xf32> to vector<128xf32>
    %9 = vector.shape_cast %8 : vector<128xf32> to vector<1x128xf32>
    %cst_8 = arith.constant 8.000000e+00 : f32
    %10 = vector.broadcast %cst_8 : f32 to vector<1x128xf32>
    %11 = arith.divf %9, %10 : vector<1x128xf32>
    %12 = vector.broadcast %11 : vector<1x128xf32> to vector<8x128xf32>
    %13 = arith.subf %3, %12 : vector<8x128xf32>
    %14 = arith.mulf %13, %13 : vector<8x128xf32>
    %cst_9 = arith.constant dense<0.000000e+00> : vector<128xf32>
    %15 = vector.multi_reduction <add>, %14, %cst_9 [0] : vector<8x128xf32> to vector<128xf32>
    %16 = vector.shape_cast %15 : vector<128xf32> to vector<1x128xf32>
    %cst_10 = arith.constant 8.000000e+00 : f32
    %17 = vector.broadcast %cst_10 : f32 to vector<1x128xf32>
    %18 = arith.divf %16, %17 : vector<1x128xf32>
    %cst_11 = arith.constant 9.99999974E-6 : f32
    %19 = vector.broadcast %cst_11 : f32 to vector<1x128xf32>
    %20 = arith.addf %18, %19 : vector<1x128xf32>
    %21 = math.rsqrt %20 : vector<1x128xf32>
    %22 = vector.broadcast %21 : vector<1x128xf32> to vector<8x128xf32>
    %23 = arith.mulf %13, %22 : vector<8x128xf32>
    %24 = vector.broadcast %5 : vector<1x128xf32> to vector<8x128xf32>
    %25 = arith.mulf %23, %24 : vector<8x128xf32>
    %26 = vector.broadcast %7 : vector<1x128xf32> to vector<8x128xf32>
    %27 = arith.addf %25, %26 : vector<8x128xf32>
    %cst_12 = arith.constant 0.000000e+00 : f32
    %28 = vector.broadcast %cst_12 : f32 to vector<8x128xf32>
    %29 = arith.maximumf %27, %28 : vector<8x128xf32>
    %30 = arith.truncf %29 : vector<8x128xf32> to vector<8x128xbf16>
    %c0_13 = arith.constant 0 : index
    %c0_14 = arith.constant 0 : index
    %c0_15 = arith.constant 0 : index
    %31 = vector.load %arg6[%c0_13, %c0_14, %c0_15] : memref<1x128x128xbf16, #tpu.memory_space<vmem>>, vector<1x128x128xbf16>
    %32 = vector.shape_cast %31 : vector<1x128x128xbf16> to vector<128x128xbf16>
    %cst_16 = arith.constant dense<0.000000e+00> : vector<8x128xf32>
    %33 = tpu.matmul %30, %32, %cst_16 {dimension_numbers = #tpu.dot_dimension_numbers<[1], [0], [0], [1], [0, 0, 1, 1], [], []>} : vector<8x128xbf16>, vector<128x128xbf16>, vector<8x128xf32> -> vector<8x128xf32>
    %c0_17 = arith.constant 0 : index
    %c0_18 = arith.constant 0 : index
    %c0_19 = arith.constant 0 : index
    %34 = vector.load %arg7[%c0_17, %c0_18, %c0_19] : memref<1x1x128xf32, #tpu.memory_space<vmem>>, vector<1x1x128xf32>
    %35 = vector.shape_cast %34 : vector<1x1x128xf32> to vector<1x128xf32>
    %36 = vector.broadcast %35 : vector<1x128xf32> to vector<8x128xf32>
    %37 = arith.addf %33, %36 : vector<8x128xf32>
    %c0_20 = arith.constant 0 : index
    %c0_21 = arith.constant 0 : index
    %c0_22 = arith.constant 0 : index
    %38 = vector.load %arg8[%c0_20, %c0_21, %c0_22] : memref<1x1x128xf32, #tpu.memory_space<vmem>>, vector<1x1x128xf32>
    %39 = vector.shape_cast %38 : vector<1x1x128xf32> to vector<1x128xf32>
    %c0_23 = arith.constant 0 : index
    %c0_24 = arith.constant 0 : index
    %c0_25 = arith.constant 0 : index
    %40 = vector.load %arg9[%c0_23, %c0_24, %c0_25] : memref<1x1x128xf32, #tpu.memory_space<vmem>>, vector<1x1x128xf32>
    %41 = vector.shape_cast %40 : vector<1x1x128xf32> to vector<1x128xf32>
    %cst_26 = arith.constant dense<0.000000e+00> : vector<128xf32>
    %42 = vector.multi_reduction <add>, %37, %cst_26 [0] : vector<8x128xf32> to vector<128xf32>
    %43 = vector.shape_cast %42 : vector<128xf32> to vector<1x128xf32>
    %cst_27 = arith.constant 8.000000e+00 : f32
    %44 = vector.broadcast %cst_27 : f32 to vector<1x128xf32>
    %45 = arith.divf %43, %44 : vector<1x128xf32>
    %46 = vector.broadcast %45 : vector<1x128xf32> to vector<8x128xf32>
    %47 = arith.subf %37, %46 : vector<8x128xf32>
    %48 = arith.mulf %47, %47 : vector<8x128xf32>
    %cst_28 = arith.constant dense<0.000000e+00> : vector<128xf32>
    %49 = vector.multi_reduction <add>, %48, %cst_28 [0] : vector<8x128xf32> to vector<128xf32>
    %50 = vector.shape_cast %49 : vector<128xf32> to vector<1x128xf32>
    %cst_29 = arith.constant 8.000000e+00 : f32
    %51 = vector.broadcast %cst_29 : f32 to vector<1x128xf32>
    %52 = arith.divf %50, %51 : vector<1x128xf32>
    %cst_30 = arith.constant 9.99999974E-6 : f32
    %53 = vector.broadcast %cst_30 : f32 to vector<1x128xf32>
    %54 = arith.addf %52, %53 : vector<1x128xf32>
    %55 = math.rsqrt %54 : vector<1x128xf32>
    %56 = vector.broadcast %55 : vector<1x128xf32> to vector<8x128xf32>
    %57 = arith.mulf %47, %56 : vector<8x128xf32>
    %58 = vector.broadcast %39 : vector<1x128xf32> to vector<8x128xf32>
    %59 = arith.mulf %57, %58 : vector<8x128xf32>
    %60 = vector.broadcast %41 : vector<1x128xf32> to vector<8x128xf32>
    %61 = arith.addf %59, %60 : vector<8x128xf32>
    %cst_31 = arith.constant 0.000000e+00 : f32
    %62 = vector.broadcast %cst_31 : f32 to vector<8x128xf32>
    %63 = arith.maximumf %61, %62 : vector<8x128xf32>
    %64 = arith.truncf %63 : vector<8x128xf32> to vector<8x128xbf16>
    %c0_32 = arith.constant 0 : index
    %c0_33 = arith.constant 0 : index
    %c0_34 = arith.constant 0 : index
    %65 = vector.load %arg10[%c0_32, %c0_33, %c0_34] : memref<1x128x128xbf16, #tpu.memory_space<vmem>>, vector<1x128x128xbf16>
    %66 = vector.shape_cast %65 : vector<1x128x128xbf16> to vector<128x128xbf16>
    %cst_35 = arith.constant dense<0.000000e+00> : vector<8x128xf32>
    %67 = tpu.matmul %64, %66, %cst_35 {dimension_numbers = #tpu.dot_dimension_numbers<[1], [0], [0], [1], [0, 0, 1, 1], [], []>} : vector<8x128xbf16>, vector<128x128xbf16>, vector<8x128xf32> -> vector<8x128xf32>
    %c0_36 = arith.constant 0 : index
    %c0_37 = arith.constant 0 : index
    %c0_38 = arith.constant 0 : index
    %68 = vector.load %arg11[%c0_36, %c0_37, %c0_38] : memref<1x1x128xf32, #tpu.memory_space<vmem>>, vector<1x1x128xf32>
    %69 = vector.shape_cast %68 : vector<1x1x128xf32> to vector<1x128xf32>
    %70 = vector.broadcast %69 : vector<1x128xf32> to vector<8x128xf32>
    %71 = arith.addf %67, %70 : vector<8x128xf32>
    %72 = arith.addf %3, %71 : vector<8x128xf32>
    %c0_39 = arith.constant 0 : index
    %c0_40 = arith.constant 0 : index
    %73 = vector.load %arg15[%c0_39, %c0_40] : memref<8x128xf32, #tpu.memory_space<vmem>>, vector<8x128xf32>
    tpu.vector_store %arg15[%c0_39, %c0_40], %72 {strides = array<i32>} : memref<8x128xf32, #tpu.memory_space<vmem>>, vector<8x128xf32>,
    %c1_i32 = arith.constant 1 : i32
    %74 = arith.cmpi eq, %arg0, %c1_i32 : i32
    %75 = arith.extui %74 : i1 to i32
    %c0_i32_41 = arith.constant 0 : i32
    %76 = arith.cmpi ne, %75, %c0_i32_41 : i32
    scf.if %76 {
      %c0_42 = arith.constant 0 : index
      %c0_43 = arith.constant 0 : index
      %77 = vector.load %arg15[%c0_42, %c0_43] : memref<8x128xf32, #tpu.memory_space<vmem>>, vector<8x128xf32>
      %78 = arith.truncf %77 : vector<8x128xf32> to vector<8x128xbf16>
      %c0_44 = arith.constant 0 : index
      %c0_45 = arith.constant 0 : index
      %79 = vector.load %arg12[%c0_44, %c0_45] : memref<128x128xbf16, #tpu.memory_space<vmem>>, vector<128x128xbf16>
      %cst_46 = arith.constant dense<0.000000e+00> : vector<8x128xf32>
      %80 = tpu.matmul %78, %79, %cst_46 {dimension_numbers = #tpu.dot_dimension_numbers<[1], [0], [0], [1], [0, 0, 1, 1], [], []>} : vector<8x128xbf16>, vector<128x128xbf16>, vector<8x128xf32> -> vector<8x128xf32>
      %c0_47 = arith.constant 0 : index
      %c0_48 = arith.constant 0 : index
      %81 = vector.load %arg13[%c0_47, %c0_48] : memref<1x128xf32, #tpu.memory_space<vmem>>, vector<1x128xf32>
      %82 = vector.broadcast %81 : vector<1x128xf32> to vector<8x128xf32>
      %83 = arith.addf %80, %82 : vector<8x128xf32>
      %c0_49 = arith.constant 0 : index
      %c0_50 = arith.constant 0 : index
      %84 = vector.load %arg14[%c0_49, %c0_50] : memref<8x128xf32, #tpu.memory_space<vmem>>, vector<8x128xf32>
      tpu.vector_store %arg14[%c0_49, %c0_50], %83 {strides = array<i32>} : memref<8x128xf32, #tpu.memory_space<vmem>>, vector<8x128xf32>,
    } else {
    }
    return
  }
  func.func @transform_0(%arg0: i32) -> (i32, i32) {
    %c0_i32 = arith.constant 0 : i32
    %c0_i32_0 = arith.constant 0 : i32
    %c0_i32_1 = arith.constant 0 : i32
    return %c0_i32, %c0_i32_0 : i32, i32
  }
  func.func @transform_1(%arg0: i32) -> (i32, i32) {
    %c0_i32 = arith.constant 0 : i32
    %c0_i32_0 = arith.constant 0 : i32
    %c0_i32_1 = arith.constant 0 : i32
    return %c0_i32, %c0_i32_0 : i32, i32
  }
  func.func @transform_2(%arg0: i32) -> (i32, i32) {
    %c0_i32 = arith.constant 0 : i32
    %c0_i32_0 = arith.constant 0 : i32
    %c0_i32_1 = arith.constant 0 : i32
    return %c0_i32, %c0_i32_0 : i32, i32
  }
  func.func @transform_3(%arg0: i32) -> (i32, i32, i32) {
    %c0_i32 = arith.constant 0 : i32
    %c0_i32_0 = arith.constant 0 : i32
    %c0_i32_1 = arith.constant 0 : i32
    return %arg0, %c0_i32, %c0_i32_0 : i32, i32, i32
  }
  func.func @transform_4(%arg0: i32) -> (i32, i32, i32) {
    %c0_i32 = arith.constant 0 : i32
    %c0_i32_0 = arith.constant 0 : i32
    %c0_i32_1 = arith.constant 0 : i32
    return %arg0, %c0_i32, %c0_i32_0 : i32, i32, i32
  }
  func.func @transform_5(%arg0: i32) -> (i32, i32, i32) {
    %c0_i32 = arith.constant 0 : i32
    %c0_i32_0 = arith.constant 0 : i32
    %c0_i32_1 = arith.constant 0 : i32
    return %arg0, %c0_i32, %c0_i32_0 : i32, i32, i32
  }
  func.func @transform_6(%arg0: i32) -> (i32, i32, i32) {
    %c0_i32 = arith.constant 0 : i32
    %c0_i32_0 = arith.constant 0 : i32
    %c0_i32_1 = arith.constant 0 : i32
    return %arg0, %c0_i32, %c0_i32_0 : i32, i32, i32
  }
  func.func @transform_7(%arg0: i32) -> (i32, i32, i32) {
    %c0_i32 = arith.constant 0 : i32
    %c0_i32_0 = arith.constant 0 : i32
    %c0_i32_1 = arith.constant 0 : i32
    return %arg0, %c0_i32, %c0_i32_0 : i32, i32, i32
  }
  func.func @transform_8(%arg0: i32) -> (i32, i32, i32) {
    %c0_i32 = arith.constant 0 : i32
    %c0_i32_0 = arith.constant 0 : i32
    %c0_i32_1 = arith.constant 0 : i32
    return %arg0, %c0_i32, %c0_i32_0 : i32, i32, i32
  }
  func.func @transform_9(%arg0: i32) -> (i32, i32, i32) {
    %c0_i32 = arith.constant 0 : i32
    %c0_i32_0 = arith.constant 0 : i32
    %c0_i32_1 = arith.constant 0 : i32
    return %arg0, %c0_i32, %c0_i32_0 : i32, i32, i32
  }
  func.func @transform_10(%arg0: i32) -> (i32, i32, i32) {
    %c0_i32 = arith.constant 0 : i32
    %c0_i32_0 = arith.constant 0 : i32
    %c0_i32_1 = arith.constant 0 : i32
    return %arg0, %c0_i32, %c0_i32_0 : i32, i32, i32
  }
  func.func @transform_11(%arg0: i32) -> (i32, i32) {
    %c0_i32 = arith.constant 0 : i32
    %c0_i32_0 = arith.constant 0 : i32
    %c0_i32_1 = arith.constant 0 : i32
    return %c0_i32, %c0_i32_0 : i32, i32
  }
  func.func @transform_12(%arg0: i32) -> (i32, i32) {
    %c0_i32 = arith.constant 0 : i32
    %c0_i32_0 = arith.constant 0 : i32
    %c0_i32_1 = arith.constant 0 : i32
    return %c0_i32, %c0_i32_0 : i32, i32
  }
  func.func @transform_13(%arg0: i32) -> (i32, i32) {
    %c0_i32 = arith.constant 0 : i32
    %c0_i32_0 = arith.constant 0 : i32
    %c0_i32_1 = arith.constant 0 : i32
    return %c0_i32, %c0_i32_0 : i32, i32
  }
}

</mosaic_0001>

<bundles_post_ra>
// kernel: tpu_custom_call.1
= control target key start
LH: loop header
LB: loop body
LE: loop exit
PB: predicated region body
PF: predicated region fallthrough
CT: control target
= control target key end

     0   :  { %s2308_s0 = inlined_call_operand.hbm [shape: bf16[8,128], index: 0, kind: input, shape index: {}]   ;;  %s2309_s1 = inlined_call_operand.hbm [shape: bf16[128,128], index: 1, kind: input, shape index: {}]   ;;  %s2310_s2 = inlined_call_operand.hbm [shape: f32[1,128], index: 2, kind: input, shape index: {}]   ;;  %s2311_s3 = inlined_call_operand.vmem [shape: f32[2,1,128], index: 3, kind: input, shape index: {}]   ;;  %s2312_s4 = inlined_call_operand.hbm [shape: f32[2,1,128], index: 4, kind: input, shape index: {}]   ;;  %s2313_s5 = inlined_call_operand.hbm [shape: bf16[2,128,128], index: 5, kind: input, shape index: {}]   ;;  %s2314_s6 = inlined_call_operand.vmem [shape: f32[2,1,128], index: 6, kind: input, shape index: {}]   ;;  %s2315_s7 = inlined_call_operand.vmem [shape: f32[2,1,128], index: 7, kind: input, shape index: {}]   ;;  %s2316_s8 = inlined_call_operand.hbm [shape: f32[2,1,128], index: 8, kind: input, shape index: {}]   ;;  %s2317_s9 = inlined_call_operand.hbm [shape: bf16[2,128,128], index: 9, kind: input, shape index: {}]   ;;  %s2318_s10 = inlined_call_operand.vmem [shape: f32[2,1,128], index: 10, kind: input, shape index: {}]   ;;  %s2319_s11 = inlined_call_operand.hbm [shape: bf16[128,128], index: 11, kind: input, shape index: {}]   ;;  %s2320_s12 = inlined_call_operand.vmem [shape: f32[1,128], index: 12, kind: input, shape index: {}]   ;;  %s2321_s13 = inlined_call_operand.hbm [shape: f32[8,128], index: 13, kind: output, shape index: {}]  }
   0x1   :  { %2329 = sst [smem:[#allocation27_spill]] %s2308_s0 }
   0x2   :  { %2330 = sst [smem:[#allocation28_spill]] %s2309_s1 }
   0x3   :  { %2331 = sst [smem:[#allocation29_spill]] %s2310_s2 }
   0x4   :  { %2332 = sst [smem:[#allocation30_spill]] %s2312_s4 }
   0x5   :  { %2333 = sst [smem:[#allocation31_spill]] %s2315_s7 }
   0x6   :  { %2334 = sst [smem:[#allocation32_spill]] %s2316_s8 }
   0x7   :  { %2335 = sst [smem:[#allocation33_spill]] %s2318_s10 }
   0x8   :  { %2336 = sst [smem:[#allocation34_spill]] %s2320_s12 }
   0x9   :  { %2337 = sst [smem:[#allocation35_spill]] %s2321_s13 }
   0xa   :  { %18 = vsyncpa [#allocation4], 0 }
   0xb   :  { %19 = vsyncpa [#allocation7], 0 }
   0xc   :  { %20 = vsyncpa [#allocation10], 0 }
   0xd   :  { %22 = vsyncpa [#allocation10 + $0x1], 0 }
   0xe   :  { %23 = vsyncpa [#allocation13], 0 }
   0xf   :  { %25 = vsyncpa [#allocation13 + $0x1], 0 }
  0x10   :  { %26 = vsyncpa [#allocation16], 0 }
  0x11   :  { %27 = vsyncpa [#allocation5], 0  ;;  %s2001_s25 = smov 0   ;;  %s2003_s26 = smov 0  }
  0x12   :  { %s2005_s27 = smov 0   ;;  %s2007_s28 = smov 0  }
  0x13 LB: > { %2338 = sst [smem:[#allocation24_spill]] %s1917_s27  ;;  %s2023_s15 = sadd.s32 4294967295, %s1921_s28   ;;  %s1921_s28 = sphi %s2007_s28, %s2360_s28   ;;  %s1917_s27 = sphi %s2005_s27, %s2362_s27   ;;  %s1913_s26 = sphi %s2003_s26, %s2364_s26   ;;  %s1909_s25 = sphi %s2001_s25, %s2363_s25  }
  0x14   : > { %s2339_s1 = sld [smem:[#allocation28_spill]]  ;;  %p1293_p0 = scmp.ge.s32.totalorder %s1921_s28, 1 }
  0x15   : > { %p143_p1 = scmp.eq.s32.totalorder %s2023_s15, 0  ;;  %p372_p2 = scmp.lt.s32.totalorder %s1921_s28, 3 }
  0x16   : > { %p1294_p3 = scmp.ne.s32.totalorder %s2023_s15, 0  ;;  %s1923_s17 = smov [#allocation6]  }
  0x17   : > { %p2029_p4 = pnand %p1293_p0, %p372_p2  ;;  %s397_s18 = sshll.u32 %s1923_s17, 4  ;;  %s398_s18 = int_to_ptr.vmem [resolvable:$true] %s397_s18 }
  0x18   : > { %s2322_s20 = smov 64   ;;  %s2324_s21 = smov 4  }
  0x19   : > { %p1508_p5 = pneg %p2029_p4  ;;  %s2047_s22 = sadd.s32 1, %s1921_s28  }
  0x1a   : > { %s395_s14 = sshll.u32 %s2339_s1, 4  ;;  %2342 = sst [smem:[#allocation25_spill]] %s2047_s22  ;;  %s396_s14 = int_to_ptr.hbm [resolvable:$true] %s395_s14 }
  0x1b   : > { %p2037_p6 = pnand %p1508_p5, %p143_p1  ;;  %s126_s23 = ssub.s32 %s1921_s28, %s2047_s22 }
  0x1c   : > { %s129_s24 = sadd.s32 1, %s1917_s27  ;;  %p127_p7 = scmp.eq.s32.totalorder %s126_s23, 0 }
  0x1d   : > { %1514 = dma.hbm_to_vmem [thread:$0]  (!%p2037_p6), %s396_s14, 1024, %s398_s18, [#allocation7], %s2322_s20, %s2322_s20, %s2324_s21  }
  0x1e   : > { %p136_p8 = scmp.ne.s32.totalorder %s1917_s27, %s1913_s26  ;;  %p137_p9 = scmp.eq.s32.totalorder %s1921_s28, 0 }
  0x1f   : > { %p142_p10 = scmp.ne.s32.totalorder %s1913_s26, %s1909_s25  ;;  %p1538_p13 = scmp.lt.s32.totalorder %s1921_s28, 2 }
  0x20   : > { %s2057_s29 = scalar_select %p127_p7, %s1917_s27, %s129_s24  }
  0x21   : > { %p138_p11 = por %p137_p9, %p136_p8  ;;  %p2061_p12 = por %p143_p1, %p142_p10 }
  0x22   : > { %2343 = sst [smem:[#allocation26_spill]] %s2057_s29  ;;  %s2068_s17 = sand.u32 1, %s1917_s27  }
  0x23   : > { %s2345_s4 = sld [smem:[#allocation30_spill]]  ;;  %s449_s24 = scalar_lea.vmem [#allocation9], %s2068_s17 }
  0x24   : > { %s456_s21 = sshll.u32 %s449_s24, 4  ;;  %p2075_p0 = pnand %p1538_p13, %p138_p11  ;;  %s457_s21 = int_to_ptr.vmem [resolvable:$true] %s456_s21 }
  0x25   : > { %s1299_s14 = sshll.u32 %s2068_s17, 6  ;;  %s2347_s22 = sand.u32 1, %s1921_s28  }
  0x26   : > { %s467_s29 = scalar_lea.vmem [#allocation11], %s1299_s14  ;;  %s2082_s13 = scalar_lea.sflag [#allocation10], %s2347_s22 }
  0x27   : > { %s475_s27 = sshll.u32 %s467_s29, 4  ;;  %p1633_p5 = pneg %p2075_p0  ;;  %s2098_s27 = int_to_ptr.vmem [resolvable:$true] %s475_s27 }
  0x29   : > { %s452_s23 = scalar_lea.hbm %s2345_s4, %s1921_s28  ;;  %s1636_s12 = scalar_lea.hbm %s2345_s4, 2 }
  0x2a   : > { %s454_s25 = sshll.u32 %s452_s23, 4  ;;  %s455_s25 = int_to_ptr.hbm [resolvable:$true] %s454_s25 }
  0x2b   : > { %s1629_s20 = sshra.s32 %s455_s25, 4  ;;  %s1630_s20 = int_to_ptr.hbm [resolvable:$true] %s1629_s20 }
  0x2c   : > { %s1631_s18 = scalar_lea.hbm %s1630_s20, 1  ;;  %p1637_p9 = scmp.lt.s32.totalorder %s1630_s20, %s2345_s4 }
  0x2d   : > { %p1632_p2 = scmp.ne.s32.totalorder %s1630_s20, %s1631_s18  ;;  %p1638_p10 = scmp.lt.s32.totalorder %s1636_s12, %s1631_s18 }
  0x2f   : > { %p1634_p7 = pnand %p1633_p5, %p1632_p2  ;;  %p1639_p11 = por %p1638_p10, %p1637_p9 }
  0x31   : > { %p1635_p8 = pneg %p1634_p7 }
  0x33   : > { %p1640_p13 = pnand %p1639_p11, %p1635_p8 }
  0x35   : > { %1643 = shalt.err (!%p1640_p13)
}
  0x36   : > { %1524 = dma.hbm_to_vmem [thread:$0]  (!%p2075_p0), %s455_s25, 16, %s457_s21, %s2082_s13  }
  0x37   : > { %s518_s22 = scalar_lea.vmem [#allocation14], %s1299_s14  ;;  %s2348_s8 = sld [smem:[#allocation32_spill]] }
  0x38   : > { %s526_s29 = sshll.u32 %s518_s22, 4  ;;  %s500_s18 = scalar_lea.vmem [#allocation12], %s2068_s17  ;;  %s2100_s29 = int_to_ptr.vmem [resolvable:$true] %s526_s29 }
  0x39   : > { %s507_s23 = sshll.u32 %s500_s18, 4  ;;  %s2349_s24 = sand.u32 1, %s1921_s28   ;;  %s508_s23 = int_to_ptr.vmem [resolvable:$true] %s507_s23 }
  0x3a   : > { %s2109_s4 = scalar_lea.sflag [#allocation13], %s2349_s24 }
  0x3d   : > { %s503_s12 = scalar_lea.hbm %s2348_s8, %s1921_s28  ;;  %s1666_s7 = scalar_lea.hbm %s2348_s8, 2 }
  0x3e   : > { %s505_s20 = sshll.u32 %s503_s12, 4  ;;  %s506_s20 = int_to_ptr.hbm [resolvable:$true] %s505_s20 }
  0x3f   : > { %s1659_s21 = sshra.s32 %s506_s20, 4  ;;  %s1660_s21 = int_to_ptr.hbm [resolvable:$true] %s1659_s21 }
  0x40   : > { %s1661_s25 = scalar_lea.hbm %s1660_s21, 1  ;;  %p1667_p9 = scmp.lt.s32.totalorder %s1660_s21, %s2348_s8 }
  0x41   : > { %p1662_p2 = scmp.ne.s32.totalorder %s1660_s21, %s1661_s25  ;;  %p1668_p10 = scmp.lt.s32.totalorder %s1666_s7, %s1661_s25 }
  0x43   : > { %p1664_p7 = pnand %p1662_p2, %p1633_p5  ;;  %p1669_p11 = por %p1668_p10, %p1667_p9 }
  0x45   : > { %p1665_p8 = pneg %p1664_p7 }
  0x47   : > { %p1670_p13 = pnand %p1669_p11, %p1665_p8 }
  0x49   : > { %1673 = shalt.err (!%p1670_p13)
}
  0x4a   : > { %1530 = dma.hbm_to_vmem [thread:$0]  (!%p2075_p0), %s506_s20, 16, %s508_s23, %s2109_s4  }
  0x4b   : > { %s2350_s0 = sld [smem:[#allocation27_spill]]  ;;  %s1926_s14 = smov [#allocation3]  }
  0x4c   : > { %s386_s22 = sshll.u32 %s1926_s14, 4  ;;  %s2351_s2 = sld [smem:[#allocation29_spill]]  ;;  %s387_s22 = int_to_ptr.vmem [resolvable:$true] %s386_s22 }
  0x4d   : > { %s1927_s10 = smov [#allocation8]   ;;  %s421_s23 = sshll.u32 %s2319_s11, 4  ;;  %s422_s23 = int_to_ptr.hbm [resolvable:$true] %s421_s23 }
  0x4e   : > { %s412_s17 = sshll.u32 %s1927_s10, 4  ;;  %s1446_s12 = sshll.u32 %s1921_s28, 6  ;;  %s413_s17 = int_to_ptr.vmem [resolvable:$true] %s412_s17 }
  0x4f   : > { %s1928_s18 = smov [#allocation15]   ;;  %s2353_s10 = smov 64  }
  0x50   : > { %s423_s14 = sshll.u32 %s1928_s18, 4  ;;  %s1786_s19 = scalar_lea.hbm %s2313_s5, 128  ;;  %s424_s14 = int_to_ptr.vmem [resolvable:$true] %s423_s14 }
  0x51   : > { %s384_s24 = sshll.u32 %s2350_s0, 4  ;;  %s472_s0 = scalar_lea.hbm %s2313_s5, %s1446_s12  ;;  %s385_s24 = int_to_ptr.hbm [resolvable:$true] %s384_s24 }
  0x52   : > { %s410_s7 = sshll.u32 %s2351_s2, 4  ;;  %s523_s2 = scalar_lea.hbm %s2317_s9, %s1446_s12  ;;  %s411_s7 = int_to_ptr.hbm [resolvable:$true] %s410_s7 }
  0x53   : > { %1511 = dma.hbm_to_vmem [thread:$0]  (!%p2037_p6), %s385_s24, 64, %s387_s22, [#allocation4]  }
  0x54   : > { %1517 = dma.hbm_to_vmem [thread:$0]  (!%p2037_p6), %s411_s7, 16, %s413_s17, [#allocation7]  }
  0x55   : > { %s473_s24 = sshll.u32 %s472_s0, 4  ;;  %s2352_s22 = smov 4   ;;  %s474_s24 = int_to_ptr.hbm [resolvable:$true] %s473_s24 }
  0x56   : > { %1520 = dma.hbm_to_vmem [thread:$0]  (!%p2037_p6), %s422_s23, 1024, %s424_s14, [#allocation16], %s2353_s10, %s2353_s10, %s2352_s22  }
  0x57   : > { %s1779_s7 = sshra.s32 %s474_s24, 4  ;;  %s1780_s7 = int_to_ptr.hbm [resolvable:$true] %s1779_s7 }
  0x58   : > { %s1781_s28 = scalar_lea.hbm %s1780_s7, 64  ;;  %p1787_p6 = scmp.lt.s32.totalorder %s1780_s7, %s2313_s5 }
  0x59   : > { %p1782_p2 = scmp.ne.s32.totalorder %s1780_s7, %s1781_s28  ;;  %p1788_p9 = scmp.lt.s32.totalorder %s1786_s19, %s1781_s28 }
  0x5b   : > { %p1784_p7 = pnand %p1782_p2, %p1633_p5  ;;  %p1789_p10 = por %p1788_p9, %p1787_p6 }
  0x5d   : > { %p1785_p8 = pneg %p1784_p7 }
  0x5f   : > { %p1790_p11 = pnand %p1789_p10, %p1785_p8 }
  0x61   : > { %1793 = shalt.err (!%p1790_p11)
}
  0x62   : > { %1527 = dma.hbm_to_vmem [thread:$0]  (!%p2075_p0), %s474_s24, 1024, %s2098_s27, %s2082_s13, %s2353_s10, %s2353_s10, %s2352_s22  }
  0x63   : > { %s524_s23 = sshll.u32 %s523_s2, 4  ;;  %s1816_s20 = scalar_lea.hbm %s2317_s9, 128  ;;  %s525_s23 = int_to_ptr.hbm [resolvable:$true] %s524_s23 }
  0x64   : > { %s1809_s12 = sshra.s32 %s525_s23, 4  ;;  %s1810_s12 = int_to_ptr.hbm [resolvable:$true] %s1809_s12 }
  0x65   : > { %s1811_s14 = scalar_lea.hbm %s1810_s12, 64  ;;  %p1817_p8 = scmp.lt.s32.totalorder %s1810_s12, %s2317_s9 }
  0x66   : > { %p1812_p13 = scmp.ne.s32.totalorder %s1810_s12, %s1811_s14  ;;  %p1818_p6 = scmp.lt.s32.totalorder %s1816_s20, %s1811_s14 }
  0x68   : > { %p1814_p2 = pnand %p1812_p13, %p1633_p5  ;;  %p1819_p9 = por %p1818_p6, %p1817_p8 }
  0x6a   : > { %p1815_p7 = pneg %p1814_p2 }
  0x6c   : > { %p1820_p10 = pnand %p1819_p9, %p1815_p7 }
  0x6e   : > { %1823 = shalt.err (!%p1820_p10)
}
  0x6f   : > { %1533 = dma.hbm_to_vmem [thread:$0]  (!%p2075_p0), %s525_s23, 1024, %s2100_s29, %s2109_s4, %s2353_s10, %s2353_s10, %s2352_s22  }
  0x70   : > { %544 = sbr.rel (%p2029_p4) target bundleno = 870 (0x366), region = 72 }
  0x75   : > { %1884 = dma.done.wait (%p143_p1), [#allocation4], 64  }
  0x76   : > { %1886 = vsyncadd (%p143_p1), [#allocation4], 4294967232 }
  0x77   : > { %1888 = dma.done.wait (%p143_p1), [#allocation7], 1040  }
  0x78   : > { %1890 = vsyncadd (%p143_p1), [#allocation7], 4294966256  ;;  %s561_s1 = sand.u32 1, %s2023_s15   ;;  %s2192_s2 = sand.u32 1, %s1913_s26  }
  0x79   : > { %s562_s4 = scalar_lea.sflag [#allocation10], %s561_s1  ;;  %s564_s13 = scalar_lea.vmem [#allocation9], %s2192_s2 }
  0x7a   : > { %1892 = dma.done.wait (%p2061_p12), %s562_s4, 1040  }
  0x7b   : > { %1894 = vsyncadd (%p2061_p12), %s562_s4, 4294966256  ;;  %s1309_s27 = sshll.u32 %s2192_s2, 6  ;;  %s581_s29 = scalar_lea.sflag [#allocation13], %s561_s1 }
  0x7c   : > { %s2200_s16 = scalar_lea.vmem [#allocation11], %s1309_s27  ;;  %s583_s24 = scalar_lea.vmem [#allocation12], %s2192_s2 }
  0x7d   : > { %1896 = dma.done.wait (%p2061_p12), %s581_s29, 1040  }
  0x7e   : > { %1898 = vsyncadd (%p2061_p12), %s581_s29, 4294966256  ;;  %s2207_s22 = scalar_lea.vmem [#allocation14], %s1309_s27 }
  0x7f   : > { %1900 = dma.done.wait (%p143_p1), [#allocation16], 1024  }
  0x80   : > { %1902 = vsyncadd (%p143_p1), [#allocation16], 4294966272  ;;  %p662_p4 = scmp.lt.s32.totalorder %s2023_s15, 1  ;;  %s2354_s14 = sld [smem:[#allocation31_spill]] }
  0x81   : > { %s2355_s7 = sld [smem:[#allocation33_spill]] }
  0x82   : > { %s2215_s10 = scalar_select %p662_p4, %s2023_s15, 1 }
  0x83   : > { %677 = sbr.rel (%p1294_p3) target bundleno = 302 (0x12e), region = 108 }
  0x84   : > { %s664_s30 = scalar_lea.vmem %s2311_s3, %s2215_s10  ;;  %s667_s21 = scalar_lea.vmem %s2314_s6, %s2215_s10 }
  0x86   : > { %s670_s25 = scalar_lea.vmem %s2354_s14, %s2215_s10 }
  0x87   : > { %s673_s28 = scalar_lea.vmem %s2355_s7, %s2215_s10 }
  0x88   : > { %v1455_v0 = vld [vmem:[#allocation6 + $0x38] sm:$0xff]  ;;  %v1454_v1 = vld [vmem:[#allocation6 + $0x30] sm:$0xff]  ;;  %v1453_v2 = vld [vmem:[#allocation6 + $0x28] sm:$0xff] }
  0x89   : > { %747 = vmatpush.bf16.msra.mxu0 %v1455_v0  ;;  %v1452_v3 = vld [vmem:[#allocation6 + $0x20] sm:$0xff]  ;;  %v1451_v4 = vld [vmem:[#allocation6 + $0x18] sm:$0xff]  ;;  %v1450_v5 = vld [vmem:[#allocation6 + $0x10] sm:$0xff] }
  0x8a   : > { %v1449_v6 = vld [vmem:[#allocation6 + $0x8] sm:$0xff]  ;;  %v1448_v7 = vld [vmem:[#allocation6] sm:$0xff]  ;;  %v678_v8 = vld [vmem:[#allocation3] sm:$0xf] }
  0x8b   : > { %v1585_v9 = vld [vmem:[#allocation8] ss:$0 sm:$0xff] }
  0x8d   : > { %748 = vmatpush.bf16.msra.mxu0 %v1454_v1 }
  0x91   : > { %749 = vmatpush.bf16.msra.mxu0 %v1453_v2 }
  0x95   : > { %750 = vmatpush.bf16.msra.mxu0 %v1452_v3 }
  0x99   : > { %751 = vmatpush.bf16.msra.mxu0 %v1451_v4 }
  0x9d   : > { %752 = vmatpush.bf16.msra.mxu0 %v1450_v5 }
  0xa1   : > { %753 = vmatpush.bf16.msra.mxu0 %v1449_v6 }
  0xa5   : > { %754 = vmatpush.bf16.msra.mxu0 %v1448_v7 }
  0xa8   : > { %755 = vmatmul.bf16.vlgmr.msra.gmra.mxu0 %v678_v8 }
 0x125   : > { %v756_v10 = vpop.f32.mrf.mxu0 }
 0x126   : > { %v757_v11 = vadd.f32 %v1585_v9, %v756_v10 }
 0x128   : > { %760 = vst [vmem:[#allocation2] sm:$0xff] %v757_v11 }
 0x12d   : > { %v758_v12 = vpop.f32.mrf.mxu0 }
 0x12e PF: > { %v1463_v13 = vld [vmem:[%s2200_s16 + $0x38] sm:$0xff]  ;;  %v1929_v14 = vmov 8.0   ;;  %v1462_v15 = vld [vmem:[%s2200_s16 + $0x30] sm:$0xff]  ;;  %v1461_v19 = vld [vmem:[%s2200_s16 + $0x28] sm:$0xff]  ;;  %p1409_p1 = scmp.ne.s32.totalorder %s2023_s15, 1 }
 0x12f   : > { %1592 = vrcp.f32 %v1929_v14  ;;  %877 = vmatpush.bf16.msra.mxu0 %v1463_v13  ;;  %v2237_v16 = vld [vmem:[#allocation2] sm:$0xff]  ;;  %v1460_v24 = vld [vmem:[%s2200_s16 + $0x20] sm:$0xff]  ;;  %v1459_v29 = vld [vmem:[%s2200_s16 + $0x18] sm:$0xff]  ;;  %s2358_s10 = sld [smem:[#allocation34_spill]] (!%p1409_p1) }
 0x130   : > { %v764_v17 = vrot.slane %v2237_v16, 4  ;;  %v1458_v33 = vld [vmem:[%s2200_s16 + $0x10] sm:$0xff]  ;;  %v1457_v36 = vld [vmem:[%s2200_s16 + $0x8] sm:$0xff]  ;;  %v1456_v39 = vld [vmem:[%s2200_s16] sm:$0xff] }
 0x131   : > { %v1586_v52 = vld [vmem:[%s664_s30] ss:$0 sm:$0xff]  ;;  %v1471_v62 = vld [vmem:[%s2207_s22 + $0x38] sm:$0xff]  ;;  %v1470_v0 = vld [vmem:[%s2207_s22 + $0x30] sm:$0xff] }
 0x132   : > { %v765_v18 = vadd.f32 %v764_v17, %v2237_v16  ;;  %v1587_v55 = vld [vmem:[%s564_s13] ss:$0 sm:$0xff]  ;;  %998 = vmatpush.bf16.msra.mxu1 %v1471_v62  ;;  %v1468_v7 = vld [vmem:[%s2207_s22 + $0x20] sm:$0xff]  ;;  %v1467_v10 = vld [vmem:[%s2207_s22 + $0x18] sm:$0xff] }
 0x133   : > { %878 = vmatpush.bf16.msra.mxu0 %v1462_v15  ;;  %v1588_v60 = vld [vmem:[%s667_s21] ss:$0 sm:$0xff]  ;;  %v1466_v13 = vld [vmem:[%s2207_s22 + $0x10] sm:$0xff] }
 0x134   : > { %v766_v21 = vrot.slane %v765_v18, 2  ;;  %v1469_v3 = vld [vmem:[%s2207_s22 + $0x28] sm:$0xff] }
 0x135   : > { %v1593_v20 = vpop.eup %1592  ;;  %v1465_v17 = vld [vmem:[%s2207_s22 + $0x8] sm:$0xff] }
 0x136   : > { %v771_v22 = vmul.f32 8.0, %v1593_v20  ;;  %v767_v23 = vadd.f32 %v766_v21, %v765_v18  ;;  %vm775_vm0 = vweird.f32 %v1593_v20  ;;  %999 = vmatpush.bf16.msra.mxu1 %v1470_v0 }
 0x137   : > { %879 = vmatpush.bf16.msra.mxu0 %v1461_v19 }
 0x138   : > { %v772_v25 = vsub.f32 1.0, %v771_v22  ;;  %v768_v26 = vrot.slane %v767_v23, 1 }
 0x13a   : > { %v773_v27 = vmul.f32 %v1593_v20, %v772_v25  ;;  %v769_v28 = vadd.f32 %v768_v26, %v767_v23  ;;  %1000 = vmatpush.bf16.msra.mxu1 %v1469_v3 }
 0x13b   : > { %880 = vmatpush.bf16.msra.mxu0 %v1460_v24 }
 0x13c   : > { %v774_v30 = vadd.f32 %v1593_v20, %v773_v27 }
 0x13e   : > { %v2244_v31 = vsel %vm775_vm0, %v1593_v20, %v774_v30  ;;  %1001 = vmatpush.bf16.msra.mxu1 %v1468_v7  ;;  %v1464_v20 = vld [vmem:[%s2207_s22] sm:$0xff] }
 0x13f   : > { %v777_v32 = vmul.f32 %v2244_v31, %v769_v28  ;;  %881 = vmatpush.bf16.msra.mxu0 %v1459_v29 }
 0x141   : > { %v778_v34 = vsub.f32 %v2237_v16, %v777_v32 }
 0x142   : > { %1002 = vmatpush.bf16.msra.mxu1 %v1467_v10 }
 0x143   : > { %v779_v35 = vmul.f32 %v778_v34, %v778_v34  ;;  %882 = vmatpush.bf16.msra.mxu0 %v1458_v33  ;;  %v1589_v33 = vld [vmem:[%s670_s25] ss:$0 sm:$0xff] }
 0x145   : > { %v780_v37 = vrot.slane %v779_v35, 4 }
 0x146   : > { %1003 = vmatpush.bf16.msra.mxu1 %v1466_v13 }
 0x147   : > { %v781_v38 = vadd.f32 %v780_v37, %v779_v35  ;;  %883 = vmatpush.bf16.msra.mxu0 %v1457_v36 }
 0x149   : > { %v782_v40 = vrot.slane %v781_v38, 2 }
 0x14a   : > { %1004 = vmatpush.bf16.msra.mxu1 %v1465_v17 }
 0x14b   : > { %v783_v41 = vadd.f32 %v782_v40, %v781_v38  ;;  %884 = vmatpush.bf16.msra.mxu0 %v1456_v39  ;;  %v1591_v40 = vld [vmem:[%s673_s28] ss:$0 sm:$0xff] }
 0x14d   : > { %v784_v42 = vrot.slane %v783_v41, 1 }
 0x14e   : > { %1005 = vmatpush.bf16.msra.mxu1 %v1464_v20 }
 0x14f   : > { %v785_v43 = vadd.f32 %v784_v42, %v783_v41 }
 0x151   : > { %v786_v44 = vmul.f32 %v785_v43, %v2244_v31 }
 0x153   : > { %v787_v45 = vadd.f32 1e-05, %v786_v44 }
 0x155   : > { %1594 = vrsqrt.f32 %v787_v45  ;;  %vm794_vm1 = vweird.f32 %v787_v45 }
 0x15b   : > { %v1595_v46 = vpop.eup %1594 }
 0x15c   : > { %v789_v47 = vmul.f32 %v1595_v46, %v787_v45  ;;  %vm795_vm2 = vweird.f32 %v1595_v46 }
 0x15d   : > { %vm796_vm3 = vmor %vm794_vm1, %vm795_vm2 }
 0x15e   : > { %v790_v48 = vmul.f32 %v1595_v46, %v789_v47 }
 0x160   : > { %v791_v49 = vmul.f32 0.5, %v790_v48 }
 0x162   : > { %v792_v50 = vsub.f32 1.5, %v791_v49 }
 0x164   : > { %v793_v51 = vmul.f32 %v1595_v46, %v792_v50 }
 0x166   : > { %v797_v53 = vsel %vm796_vm3, %v1595_v46, %v793_v51 }
 0x167   : > { %v798_v54 = vmul.f32 %v797_v53, %v778_v34 }
 0x169   : > { %v802_v56 = vmul.f32 %v1586_v52, %v798_v54 }
 0x16b   : > { %v806_v57 = vadd.f32 %v1587_v55, %v802_v56 }
 0x16d   : > { %v807_v58 = vmax.f32 %v806_v57, 0.0 }
 0x16f   : > { %v808_v59 = vpack.c.bf16 %v807_v58, %v807_v58 }
 0x171   : > { %885 = vmatmul.bf16.vlgmr.msra.gmra.mxu0 %v808_v59 }
 0x1ee   : > { %v886_v61 = vpop.f32.mrf.mxu0 }
 0x1ef   : > { %v887_v63 = vadd.f32 %v1588_v60, %v886_v61 }
 0x1f1   : > { %v892_v1 = vrot.slane %v887_v63, 4 }
 0x1f3   : > { %v893_v2 = vadd.f32 %v892_v1, %v887_v63 }
 0x1f5   : > { %v894_v4 = vrot.slane %v893_v2, 2 }
 0x1f6   : > { %v888_v5 = vpop.f32.mrf.mxu0 }
 0x1f7   : > { %v895_v6 = vadd.f32 %v894_v4, %v893_v2 }
 0x1f9   : > { %v896_v8 = vrot.slane %v895_v6, 1 }
 0x1fb   : > { %v897_v9 = vadd.f32 %v896_v8, %v895_v6 }
 0x1fd   : > { %v898_v11 = vmul.f32 %v897_v9, %v2244_v31 }
 0x1ff   : > { %v899_v12 = vsub.f32 %v887_v63, %v898_v11 }
 0x201   : > { %v900_v14 = vmul.f32 %v899_v12, %v899_v12 }
 0x203   : > { %v901_v15 = vrot.slane %v900_v14, 4 }
 0x205   : > { %v902_v18 = vadd.f32 %v901_v15, %v900_v14 }
 0x207   : > { %v903_v19 = vrot.slane %v902_v18, 2 }
 0x209   : > { %v904_v21 = vadd.f32 %v903_v19, %v902_v18 }
 0x20b   : > { %v905_v22 = vrot.slane %v904_v21, 1 }
 0x20d   : > { %v906_v23 = vadd.f32 %v905_v22, %v904_v21 }
 0x20f   : > { %v907_v24 = vmul.f32 %v906_v23, %v2244_v31  ;;  %v1590_v31 = vld [vmem:[%s583_s24] ss:$0 sm:$0xff] }
 0x211   : > { %v908_v25 = vadd.f32 1e-05, %v907_v24 }
 0x213   : > { %1596 = vrsqrt.f32 %v908_v25  ;;  %vm915_vm5 = vweird.f32 %v908_v25 }
 0x219   : > { %v1597_v26 = vpop.eup %1596 }
 0x21a   : > { %v910_v27 = vmul.f32 %v1597_v26, %v908_v25  ;;  %vm916_vm4 = vweird.f32 %v1597_v26 }
 0x21b   : > { %vm917_vm6 = vmor %vm915_vm5, %vm916_vm4 }
 0x21c   : > { %v911_v28 = vmul.f32 %v1597_v26, %v910_v27 }
 0x21e   : > { %v912_v29 = vmul.f32 0.5, %v911_v28 }
 0x220   : > { %v913_v30 = vsub.f32 1.5, %v912_v29 }
 0x222   : > { %v914_v32 = vmul.f32 %v1597_v26, %v913_v30 }
 0x224   : > { %v918_v34 = vsel %vm917_vm6, %v1597_v26, %v914_v32 }
 0x225   : > { %v919_v35 = vmul.f32 %v918_v34, %v899_v12 }
 0x227   : > { %v923_v36 = vmul.f32 %v1589_v33, %v919_v35 }
 0x229   : > { %v927_v37 = vadd.f32 %v1590_v31, %v923_v36 }
 0x22b   : > { %v928_v38 = vmax.f32 %v927_v37, 0.0 }
 0x22d   : > { %v929_v39 = vpack.c.bf16 %v928_v38, %v928_v38 }
 0x22f   : > { %1006 = vmatmul.bf16.vlgmr.msra.gmra.mxu1 %v929_v39 }
 0x2ac   : > { %v1007_v41 = vpop.f32.mrf.mxu1 }
 0x2ad   : > { %v1008_v42 = vadd.f32 %v1591_v40, %v1007_v41 }
 0x2af   : > { %v1011_v43 = vadd.f32 %v1008_v42, %v2237_v16 }
 0x2b0   : > { %1016 = sbr.rel (%p1409_p1) target bundleno = 859 (0x35b), region = 112 }
 0x2b1   : > { %1012 = vst [vmem:[#allocation2] sm:$0xff] %v1011_v43 }
 0x2b4   : > { %v1009_v44 = vpop.f32.mrf.mxu1 }
 0x2b5   : > { %v1479_v45 = vld [vmem:[#allocation15 + $0x38] sm:$0xff]  ;;  %v1478_v46 = vld [vmem:[#allocation15 + $0x30] sm:$0xff]  ;;  %v1477_v47 = vld [vmem:[#allocation15 + $0x28] sm:$0xff] }
 0x2b6   : > { %1087 = vmatpush.bf16.msra.mxu0 %v1479_v45  ;;  %v1476_v48 = vld [vmem:[#allocation15 + $0x20] sm:$0xff]  ;;  %v1475_v49 = vld [vmem:[#allocation15 + $0x18] sm:$0xff]  ;;  %v1474_v50 = vld [vmem:[#allocation15 + $0x10] sm:$0xff] }
 0x2b7   : > { %v1473_v51 = vld [vmem:[#allocation15 + $0x8] sm:$0xff]  ;;  %v1472_v16 = vld [vmem:[#allocation15] sm:$0xff] }
 0x2b8   : > { %v1017_v52 = vld [vmem:[#allocation2] sm:$0xff] }
 0x2b9   : > { %v1018_v53 = vpack.c.bf16 %v1017_v52, %v1017_v52  ;;  %v1598_v54 = vld [vmem:[%s2358_s10] ss:$0 sm:$0xff] }
 0x2ba   : > { %1088 = vmatpush.bf16.msra.mxu0 %v1478_v46 }
 0x2be   : > { %1089 = vmatpush.bf16.msra.mxu0 %v1477_v47 }
 0x2c2   : > { %1090 = vmatpush.bf16.msra.mxu0 %v1476_v48 }
 0x2c6   : > { %1091 = vmatpush.bf16.msra.mxu0 %v1475_v49 }
 0x2ca   : > { %1092 = vmatpush.bf16.msra.mxu0 %v1474_v50 }
 0x2ce   : > { %1093 = vmatpush.bf16.msra.mxu0 %v1473_v51 }
 0x2d2   : > { %1094 = vmatpush.bf16.msra.mxu0 %v1472_v16 }
 0x2d5   : > { %1095 = vmatmul.bf16.vlgmr.msra.gmra.mxu0 %v1018_v53 }
 0x352   : > { %v1096_v55 = vpop.f32.mrf.mxu0 }
 0x353   : > { %v1097_v56 = vadd.f32 %v1598_v54, %v1096_v55 }
 0x355   : > { %1100 = vst [vmem:[#allocation17] sm:$0xff] %v1097_v56 }
 0x35a   : > { %v1098_v57 = vpop.f32.mrf.mxu0 }
 0x35b PF: > { %p1543_p3 = scmp.eq.s32.totalorder %s2023_s15, 1  ;;  %s1930_s19 = smov [#allocation17]  }
 0x35c   : > { %s1107_s18 = sshll.u32 %s1930_s19, 4  ;;  %s2359_s12 = sld [smem:[#allocation35_spill]]  ;;  %s1108_s18 = int_to_ptr.vmem [resolvable:$true] %s1107_s18 }
 0x362   : > { %s1109_s14 = sshll.u32 %s2359_s12, 4  ;;  %s1110_s14 = int_to_ptr.hbm [resolvable:$true] %s1109_s14 }
 0x363   : > { %1505 = dma.vmem_to_hbm [thread:$0]  (%p1543_p3), %s1108_s18, 128, %s1110_s14, [#allocation5]  }
 0x364   : > { %1904 = dma.done.wait (%p1543_p3), [#allocation5], 128  }
 0x365   : > { %1906 = vsyncadd (%p1543_p3), [#allocation5], 4294967168 }
 0x366 PF: > { %s2360_s28 = sld [smem:[#allocation25_spill]]  ;;  %s2363_s25 = smov %s1913_s26 }
 0x367   : > { %s2361_s8 = sld [smem:[#allocation24_spill]] }
 0x368   : > { %s2362_s27 = sld [smem:[#allocation26_spill]] }
 0x36c   : > { %p30_p12 = scmp.ge.s32.totalorder %s2360_s28, 4  }
 0x36d   : > { %s2364_s26 = smov %s2361_s8 }
 0x36e   :  { %32 = sbr.rel (!%p30_p12) target bundleno = 19 (0x13), region = 181 }
 0x373   :  { %1123 = vsyncpa [#allocation4], 1 }
 0x374   :  { %1125 = vsyncpa [#allocation4 + $0x1], 1 }
 0x375   :  { %1126 = vsyncpa [#allocation7], 1 }
 0x376   :  { %1127 = vsyncpa [#allocation10], 1 }
 0x377   :  { %1129 = vsyncpa [#allocation10 + $0x1], 1 }
 0x378   :  { %1130 = vsyncpa [#allocation13], 1 }
 0x379   :  { %1132 = vsyncpa [#allocation13 + $0x1], 1 }
 0x37a   :  { %1133 = vsyncpa [#allocation16], 1 }
 0x37b   :  { %1134 = vsyncpa [#allocation5], 1 }
 0x37c   :  { %1136 = vsyncpa [#allocation5 + $0x1], 1 }

</bundles_post_ra>
